<compile_context>
chip_gen: v5e
topology: v5e:2x2
jax: 0.10.0
libtpu: 0.0.40
codegen_flags: <defaults>
</compile_context>

<pallas_src>
import jax
import jax.numpy as jnp
import numpy as np
from jax.experimental import pallas as pl
from jax.experimental.pallas import tpu as pltpu

N_ACTIONS = 27              # 3**3 joint-action combinations, as in create_actions_space()
H1, H2, H3 = 256, 256, 128  # hidden widths padded from 192 / 256 / 64 for lane density
N_PAD = 128                 # output width padded from 27 -> 128 for unmasked stores


# ----------------------------- kernel bodies ---------------------------------

def _mlp_q(x_ref, w1_ref, b1_ref, w2_ref, b2_ref, w3_ref, b3_ref, w4_ref, b4_ref):
    """bf16 MXU matmuls with f32 accumulate; bias-add / ReLU stay f32 (v5e-safe)."""
    x = x_ref[...].astype(jnp.bfloat16)                  # in-kernel cast (VPU, free)
    h = jnp.dot(x, w1_ref[...], preferred_element_type=jnp.float32) + b1_ref[...]
    h = jnp.maximum(h, 0.0)
    h = jnp.dot(h.astype(jnp.bfloat16), w2_ref[...],
                preferred_element_type=jnp.float32) + b2_ref[...]
    h = jnp.maximum(h, 0.0)
    h = jnp.dot(h.astype(jnp.bfloat16), w3_ref[...],
                preferred_element_type=jnp.float32) + b3_ref[...]
    h = jnp.maximum(h, 0.0)
    q = jnp.dot(h.astype(jnp.bfloat16), w4_ref[...],
                preferred_element_type=jnp.float32) + b4_ref[...]
    return q                                             # (tile_b, N_PAD) f32


def _greedy_idx(qf):
    """Greedy argmax over the real 27 action lanes (padded lanes masked to -inf).

    Ties break to the lowest index (matches jnp.argmax).  Index is clamped so a
    NaN row yields 26 rather than an out-of-range action.
    """
    lane = jax.lax.broadcasted_iota(jnp.int32, qf.shape, 1)
    qm = jnp.where(lane < N_ACTIONS, qf, -jnp.inf)
    qmax = jnp.max(qm, axis=-1, keepdims=True)
    idx = jnp.min(jnp.where(qm == qmax, lane, N_PAD), axis=-1, keepdims=True)
    return jnp.minimum(idx, N_ACTIONS - 1).astype(jnp.int32)


def dqn_mlp_kernel(x_ref, w1_ref, b1_ref, w2_ref, b2_ref, w3_ref, b3_ref,
                   w4_ref, b4_ref, q_ref, a_ref):
    q = _mlp_q(x_ref, w1_ref, b1_ref, w2_ref, b2_ref, w3_ref, b3_ref, w4_ref, b4_ref)
    q_bf = q.astype(jnp.bfloat16)
    q_ref[...] = q_bf                      # lane-dense bf16 store (half the f32 bytes)
    # Argmax on the bf16-rounded values so argmax(stored Q) == stored actions.
    a_ref[...] = _greedy_idx(q_bf.astype(jnp.float32))


def dqn_act_kernel(x_ref, w1_ref, b1_ref, w2_ref, b2_ref, w3_ref, b3_ref,
                   w4_ref, b4_ref, a_ref):
    # Actions-only mode: skip the Q writeback entirely (acting / greedy path).
    q = _mlp_q(x_ref, w1_ref, b1_ref, w2_ref, b2_ref, w3_ref, b3_ref, w4_ref, b4_ref)
    a_ref[...] = _greedy_idx(q.astype(jnp.bfloat16).astype(jnp.float32))


# ------------------------------ host wrappers ---------------------------------

def _round_up(n, m):
    return ((n + m - 1) // m) * m


def _cdiv(a, b):
    return -(-a // b)


def _resident_spec(p):
    # Full-array block; constant (0,...,0) block index for every batch tile so the
    # weights/biases stay VMEM-resident (no re-DMA per grid step).
    ndim = p.ndim  # bound eagerly (no late-binding closure bug)
    return pl.BlockSpec(p.shape, lambda i, _nd=ndim: (0,) * _nd)


def _tiling(batch, tile_b_max):
    """Pick (tile_b, num_tiles, padded_batch).

    - tile_b derived from the batch (tail padding < 16 rows per tile),
      rounded to 16 to match bf16 (16,128) sublane packing.
    - At least 2 tiles when the batch is large so v7x's 2 TensorCores both work.
    """
    num_tiles = max(1, _cdiv(batch, tile_b_max))
    if num_tiles == 1 and batch >= 256:
        num_tiles = 2
    tile_b = _round_up(_cdiv(batch, num_tiles), 16)
    return tile_b, num_tiles, tile_b * num_tiles


def _compiler_params(tile_b):
    kwargs = dict(dimension_semantics=("parallel",))  # shard batch tiles over TCs
    if tile_b >= 2048:
        # v5e's default scoped-VMEM limit is 16 MiB; very large tiles need more.
        kwargs["vmem_limit_bytes"] = 48 * 1024 * 1024
    return pltpu.CompilerParams(**kwargs)


def _in_specs(tile_b, state_dim, w_and_b):
    specs = [pl.BlockSpec((tile_b, state_dim), lambda i: (i, 0))]
    specs += [_resident_spec(p) for p in w_and_b]
    return specs


def _params_tuple(params):
    return tuple(params[k] for k in ("w1", "b1", "w2", "b2", "w3", "b3", "w4", "b4"))


def dqn_forward(x, params, *, tile_b_max=1024, trim=True):
    """x: (batch, state_dim) float32.

    Returns (qvalues, greedy_actions).
      trim=True  -> qvalues (batch, N_ACTIONS) bf16, actions (batch,) int32
                    (matches the PyTorch module's forward semantics).
      trim=False -> padded (batch_p, 128) / (batch_p, 1) arrays so the :27 slice
                    can be fused into the consumer instead of a separate XLA op.
    """
    batch, state_dim = x.shape
    tile_b, num_tiles, batch_p = _tiling(batch, tile_b_max)
    x_p = x if batch_p == batch else jnp.pad(x, ((0, batch_p - batch), (0, 0)))
    w_and_b = _params_tuple(params)

    q_pad, a_pad = pl.pallas_call(
        dqn_mlp_kernel,
        grid=(num_tiles,),
        in_specs=_in_specs(tile_b, state_dim, w_and_b),
        out_specs=(pl.BlockSpec((tile_b, N_PAD), lambda i: (i, 0)),
                   pl.BlockSpec((tile_b, 1), lambda i: (i, 0))),
        out_shape=(jax.ShapeDtypeStruct((batch_p, N_PAD), jnp.bfloat16),
                   jax.ShapeDtypeStruct((batch_p, 1), jnp.int32)),
        compiler_params=_compiler_params(tile_b),
    )(x_p, *w_and_b)

    if trim:
        return q_pad[:batch, :N_ACTIONS], a_pad[:batch, 0]
    return q_pad, a_pad


def dqn_greedy_actions(x, params, *, tile_b_max=1024, trim=True):
    """Actions-only path: identical MLP + fused argmax, no Q writeback."""
    batch, state_dim = x.shape
    tile_b, num_tiles, batch_p = _tiling(batch, tile_b_max)
    x_p = x if batch_p == batch else jnp.pad(x, ((0, batch_p - batch), (0, 0)))
    w_and_b = _params_tuple(params)

    a_pad = pl.pallas_call(
        dqn_act_kernel,
        grid=(num_tiles,),
        in_specs=_in_specs(tile_b, state_dim, w_and_b),
        out_specs=pl.BlockSpec((tile_b, 1), lambda i: (i, 0)),
        out_shape=jax.ShapeDtypeStruct((batch_p, 1), jnp.int32),
        compiler_params=_compiler_params(tile_b),
    )(x_p, *w_and_b)

    if trim:
        return a_pad[:batch, 0]
    return a_pad


# --------------------------- params / reference --------------------------------

def init_params(key, state_dim):
    """PyTorch nn.Linear-style init (uniform +-1/sqrt(fan_in)) at the TRUE widths
    (192 / 256 / 64 / 27).  Weights stored as (in, out) = transpose of PyTorch's
    (out, in) layout so the kernel computes y = x @ W + b."""
    real = {}
    dims = [(state_dim, 192), (192, 256), (256, 64), (64, N_ACTIONS)]
    for idx, (fan_in, fan_out) in enumerate(dims, start=1):
        key, kw, kb = jax.random.split(key, 3)
        bound = 1.0 / np.sqrt(fan_in)
        real[f"w{idx}"] = jax.random.uniform(kw, (fan_in, fan_out), jnp.float32,
                                             minval=-bound, maxval=bound)
        real[f"b{idx}"] = jax.random.uniform(kb, (1, fan_out), jnp.float32,
                                             minval=-bound, maxval=bound)
    return real


def pad_params(real, state_dim):
    """Zero-pad layer widths to lane-dense sizes (192->256, 64->128, 27->128).
    Weights are stored bf16 for the MXU; biases stay f32 for the VPU add.
    Zero padding is exact: padded lanes/rows contribute exactly 0."""
    in_dims = [state_dim, H1, H2, H3]
    out_dims = [H1, H2, H3, N_PAD]
    kern = {}
    for idx, (din, dout) in enumerate(zip(in_dims, out_dims), start=1):
        w, b = real[f"w{idx}"], real[f"b{idx}"]
        w_p = jnp.zeros((din, dout), jnp.float32).at[:w.shape[0], :w.shape[1]].set(w)
        b_p = jnp.zeros((1, dout), jnp.float32).at[:, :b.shape[1]].set(b)
        kern[f"w{idx}"] = w_p.astype(jnp.bfloat16)
        kern[f"b{idx}"] = b_p
    return kern


def reference_forward(x, real):
    """Pure-JAX reference with the same bf16-in / f32-accumulate precision."""
    def mm(a, w):
        return jnp.dot(a.astype(jnp.bfloat16), w.astype(jnp.bfloat16),
                       preferred_element_type=jnp.float32)
    h = jnp.maximum(mm(x, real["w1"]) + real["b1"], 0.0)
    h = jnp.maximum(mm(h, real["w2"]) + real["b2"], 0.0)
    h = jnp.maximum(mm(h, real["w3"]) + real["b3"], 0.0)
    return mm(h, real["w4"]) + real["b4"]


# ----------------------------------- main ---------------------------------------

if __name__ == "__main__":
    key = jax.random.PRNGKey(0)
    state_dim = 32  # consistent with state_shape=32

    real_params = init_params(key, state_dim)
    kern_params = pad_params(real_params, state_dim)

    # Small smoke test (single batch tile).
    key, kx = jax.random.split(key)
    x_small = jax.random.normal(kx, (8, state_dim), jnp.float32)
    q, act = dqn_forward(x_small, kern_params)
    q, act = jax.block_until_ready((q, act))
    assert q.shape == (8, N_ACTIONS) and act.shape == (8,)
    q_f32 = np.asarray(jnp.asarray(q, jnp.float32))
    q_ref = np.asarray(reference_forward(x_small, real_params))
    np.testing.assert_allclose(q_f32, q_ref, atol=2e-2, rtol=2e-2)
    np.testing.assert_array_equal(np.asarray(act),
                                  np.asarray(jnp.argmax(q, axis=-1)))
    act_only = jax.block_until_ready(dqn_greedy_actions(x_small, kern_params))
    np.testing.assert_array_equal(np.asarray(act_only), np.asarray(act))

    # Batched path: batch not a multiple of 16 -> minimal zero-pad + 2-tile grid
    # (tile_b chosen from the batch, >= 2 tiles for v7x megacore).
    key, kx = jax.random.split(key)
    x_big = jax.random.normal(kx, (300, state_dim), jnp.float32)
    q_big, act_big = dqn_forward(x_big, kern_params)
    q_big, act_big = jax.block_until_ready((q_big, act_big))
    q_big_f32 = np.asarray(jnp.asarray(q_big, jnp.float32))
    q_big_ref = np.asarray(reference_forward(x_big, real_params))
    np.testing.assert_allclose(q_big_f32, q_big_ref, atol=2e-2, rtol=2e-2)
    np.testing.assert_array_equal(np.asarray(act_big),
                                  np.asarray(jnp.argmax(q_big, axis=-1)))
    act_big_only = jax.block_until_ready(dqn_greedy_actions(x_big, kern_params))
    np.testing.assert_array_equal(np.asarray(act_big_only), np.asarray(act_big))

    # TODO(synk): epsilon-greedy sample_actions (host-side numpy RNG via
    # np.random.choice) and the actions_space joint-action lookup stay outside the
    # kernel; the fused in-kernel greedy argmax already supplies the best-action
    # indices it consumes.  (In-kernel epsilon-greedy via pltpu.prng_* is possible
    # but would change the module's host-RNG semantics.)
    print("KERNEL_OK")
</pallas_src>

<mosaic_0001>
module attributes {stable_mosaic.version = 11 : i64} {
  func.func @dqn_mlp_kernel(%arg0: i32, %arg1: memref<16x32xf32, #tpu.memory_space<vmem>>, %arg2: memref<32x256xbf16, #tpu.memory_space<vmem>>, %arg3: memref<1x256xf32, #tpu.memory_space<vmem>>, %arg4: memref<256x256xbf16, #tpu.memory_space<vmem>>, %arg5: memref<1x256xf32, #tpu.memory_space<vmem>>, %arg6: memref<256x128xbf16, #tpu.memory_space<vmem>>, %arg7: memref<1x128xf32, #tpu.memory_space<vmem>>, %arg8: memref<128x128xbf16, #tpu.memory_space<vmem>>, %arg9: memref<1x128xf32, #tpu.memory_space<vmem>>, %arg10: memref<16x128xbf16, #tpu.memory_space<vmem>>, %arg11: memref<16x1xi32, #tpu.memory_space<vmem>>) attributes {dimension_semantics = [#tpu.dimension_semantics<parallel>], iteration_bounds = array<i64: 1>, scalar_prefetch = 0 : i64, scratch_operands = 0 : i64, tpu.core_type = #tpu.core_type<tc>, window_params = [{transform_indices = @transform_0, window_bounds = array<i64: 16, 32>}, {pipeline_mode = #tpu.pipeline_mode<synchronous>, transform_indices = @transform_1, window_bounds = array<i64: 32, 256>}, {pipeline_mode = #tpu.pipeline_mode<synchronous>, transform_indices = @transform_2, window_bounds = array<i64: 1, 256>}, {pipeline_mode = #tpu.pipeline_mode<synchronous>, transform_indices = @transform_3, window_bounds = array<i64: 256, 256>}, {pipeline_mode = #tpu.pipeline_mode<synchronous>, transform_indices = @transform_4, window_bounds = array<i64: 1, 256>}, {pipeline_mode = #tpu.pipeline_mode<synchronous>, transform_indices = @transform_5, window_bounds = array<i64: 256, 128>}, {pipeline_mode = #tpu.pipeline_mode<synchronous>, transform_indices = @transform_6, window_bounds = array<i64: 1, 128>}, {pipeline_mode = #tpu.pipeline_mode<synchronous>, transform_indices = @transform_7, window_bounds = array<i64: 128, 128>}, {pipeline_mode = #tpu.pipeline_mode<synchronous>, transform_indices = @transform_8, window_bounds = array<i64: 1, 128>}, {transform_indices = @transform_9, window_bounds = array<i64: 16, 128>}, {transform_indices = @transform_10, window_bounds = array<i64: 16, 1>}]} {
    %c0 = arith.constant 0 : index
    %c0_0 = arith.constant 0 : index
    %0 = vector.load %arg1[%c0, %c0_0] : memref<16x32xf32, #tpu.memory_space<vmem>>, vector<16x32xf32>
    %1 = arith.truncf %0 : vector<16x32xf32> to vector<16x32xbf16>
    %c0_1 = arith.constant 0 : index
    %c0_2 = arith.constant 0 : index
    %2 = vector.load %arg2[%c0_1, %c0_2] : memref<32x256xbf16, #tpu.memory_space<vmem>>, vector<32x256xbf16>
    %cst = arith.constant dense<0.000000e+00> : vector<16x256xf32>
    %3 = tpu.matmul %1, %2, %cst {dimension_numbers = #tpu.dot_dimension_numbers<[1], [0], [0], [1], [0, 0, 1, 1], [], []>} : vector<16x32xbf16>, vector<32x256xbf16>, vector<16x256xf32> -> vector<16x256xf32>
    %c0_3 = arith.constant 0 : index
    %c0_4 = arith.constant 0 : index
    %4 = vector.load %arg3[%c0_3, %c0_4] : memref<1x256xf32, #tpu.memory_space<vmem>>, vector<1x256xf32>
    %5 = vector.broadcast %4 : vector<1x256xf32> to vector<16x256xf32>
    %6 = arith.addf %3, %5 : vector<16x256xf32>
    %cst_5 = arith.constant 0.000000e+00 : f32
    %7 = vector.broadcast %cst_5 : f32 to vector<16x256xf32>
    %8 = arith.maximumf %6, %7 : vector<16x256xf32>
    %9 = arith.truncf %8 : vector<16x256xf32> to vector<16x256xbf16>
    %c0_6 = arith.constant 0 : index
    %c0_7 = arith.constant 0 : index
    %10 = vector.load %arg4[%c0_6, %c0_7] : memref<256x256xbf16, #tpu.memory_space<vmem>>, vector<256x256xbf16>
    %cst_8 = arith.constant dense<0.000000e+00> : vector<16x256xf32>
    %11 = tpu.matmul %9, %10, %cst_8 {dimension_numbers = #tpu.dot_dimension_numbers<[1], [0], [0], [1], [0, 0, 1, 1], [], []>} : vector<16x256xbf16>, vector<256x256xbf16>, vector<16x256xf32> -> vector<16x256xf32>
    %c0_9 = arith.constant 0 : index
    %c0_10 = arith.constant 0 : index
    %12 = vector.load %arg5[%c0_9, %c0_10] : memref<1x256xf32, #tpu.memory_space<vmem>>, vector<1x256xf32>
    %13 = vector.broadcast %12 : vector<1x256xf32> to vector<16x256xf32>
    %14 = arith.addf %11, %13 : vector<16x256xf32>
    %cst_11 = arith.constant 0.000000e+00 : f32
    %15 = vector.broadcast %cst_11 : f32 to vector<16x256xf32>
    %16 = arith.maximumf %14, %15 : vector<16x256xf32>
    %17 = arith.truncf %16 : vector<16x256xf32> to vector<16x256xbf16>
    %c0_12 = arith.constant 0 : index
    %c0_13 = arith.constant 0 : index
    %18 = vector.load %arg6[%c0_12, %c0_13] : memref<256x128xbf16, #tpu.memory_space<vmem>>, vector<256x128xbf16>
    %cst_14 = arith.constant dense<0.000000e+00> : vector<16x128xf32>
    %19 = tpu.matmul %17, %18, %cst_14 {dimension_numbers = #tpu.dot_dimension_numbers<[1], [0], [0], [1], [0, 0, 1, 1], [], []>} : vector<16x256xbf16>, vector<256x128xbf16>, vector<16x128xf32> -> vector<16x128xf32>
    %c0_15 = arith.constant 0 : index
    %c0_16 = arith.constant 0 : index
    %20 = vector.load %arg7[%c0_15, %c0_16] : memref<1x128xf32, #tpu.memory_space<vmem>>, vector<1x128xf32>
    %21 = vector.broadcast %20 : vector<1x128xf32> to vector<16x128xf32>
    %22 = arith.addf %19, %21 : vector<16x128xf32>
    %cst_17 = arith.constant 0.000000e+00 : f32
    %23 = vector.broadcast %cst_17 : f32 to vector<16x128xf32>
    %24 = arith.maximumf %22, %23 : vector<16x128xf32>
    %25 = arith.truncf %24 : vector<16x128xf32> to vector<16x128xbf16>
    %c0_18 = arith.constant 0 : index
    %c0_19 = arith.constant 0 : index
    %26 = vector.load %arg8[%c0_18, %c0_19] : memref<128x128xbf16, #tpu.memory_space<vmem>>, vector<128x128xbf16>
    %cst_20 = arith.constant dense<0.000000e+00> : vector<16x128xf32>
    %27 = tpu.matmul %25, %26, %cst_20 {dimension_numbers = #tpu.dot_dimension_numbers<[1], [0], [0], [1], [0, 0, 1, 1], [], []>} : vector<16x128xbf16>, vector<128x128xbf16>, vector<16x128xf32> -> vector<16x128xf32>
    %c0_21 = arith.constant 0 : index
    %c0_22 = arith.constant 0 : index
    %28 = vector.load %arg9[%c0_21, %c0_22] : memref<1x128xf32, #tpu.memory_space<vmem>>, vector<1x128xf32>
    %29 = vector.broadcast %28 : vector<1x128xf32> to vector<16x128xf32>
    %30 = arith.addf %27, %29 : vector<16x128xf32>
    %31 = arith.truncf %30 : vector<16x128xf32> to vector<16x128xbf16>
    %c0_23 = arith.constant 0 : index
    %c0_24 = arith.constant 0 : index
    %32 = vector.load %arg10[%c0_23, %c0_24] : memref<16x128xbf16, #tpu.memory_space<vmem>>, vector<16x128xbf16>
    tpu.vector_store %arg10[%c0_23, %c0_24], %31 {strides = array<i32>} : memref<16x128xbf16, #tpu.memory_space<vmem>>, vector<16x128xbf16>,
    %33 = arith.extf %31 : vector<16x128xbf16> to vector<16x128xf32>
    %34 = tpu.iota {dimensions = array<i32: 1>} : vector<16x128xi32>
    %c27_i32 = arith.constant 27 : i32
    %35 = vector.broadcast %c27_i32 : i32 to vector<16x128xi32>
    %36 = arith.cmpi slt, %34, %35 : vector<16x128xi32>
    %cst_25 = arith.constant 0xFF800000 : f32
    %37 = vector.broadcast %cst_25 : f32 to vector<16x128xf32>
    %38 = arith.select %36, %33, %37 : vector<16x128xi1>, vector<16x128xf32>
    %cst_26 = arith.constant dense<0xFF800000> : vector<16xf32>
    %39 = vector.multi_reduction <maximumf>, %38, %cst_26 [1] : vector<16x128xf32> to vector<16xf32>
    %40 = vector.shape_cast %39 : vector<16xf32> to vector<16x1xf32>
    %41 = vector.broadcast %40 : vector<16x1xf32> to vector<16x128xf32>
    %42 = arith.cmpf oeq, %38, %41 : vector<16x128xf32>
    %c128_i32 = arith.constant 128 : i32
    %43 = vector.broadcast %c128_i32 : i32 to vector<16x128xi32>
    %44 = arith.select %42, %34, %43 : vector<16x128xi1>, vector<16x128xi32>
    %cst_27 = arith.constant dense<2147483647> : vector<16xi32>
    %45 = vector.multi_reduction <minsi>, %44, %cst_27 [1] : vector<16x128xi32> to vector<16xi32>
    %46 = vector.shape_cast %45 : vector<16xi32> to vector<16x1xi32>
    %c26_i32 = arith.constant 26 : i32
    %47 = vector.broadcast %c26_i32 : i32 to vector<16x1xi32>
    %48 = arith.minsi %46, %47 : vector<16x1xi32>
    %c0_28 = arith.constant 0 : index
    %c0_29 = arith.constant 0 : index
    %49 = vector.load %arg11[%c0_28, %c0_29] : memref<16x1xi32, #tpu.memory_space<vmem>>, vector<16x1xi32>
    tpu.vector_store %arg11[%c0_28, %c0_29], %48 {strides = array<i32>} : memref<16x1xi32, #tpu.memory_space<vmem>>, vector<16x1xi32>,
    return
  }
  func.func @transform_0(%arg0: i32) -> (i32, i32) {
    %c0_i32 = arith.constant 0 : i32
    %c0_i32_0 = arith.constant 0 : i32
    return %arg0, %c0_i32 : i32, i32
  }
  func.func @transform_1(%arg0: i32) -> (i32, i32) {
    %c0_i32 = arith.constant 0 : i32
    %c0_i32_0 = arith.constant 0 : i32
    %c0_i32_1 = arith.constant 0 : i32
    return %c0_i32, %c0_i32_0 : i32, i32
  }
  func.func @transform_2(%arg0: i32) -> (i32, i32) {
    %c0_i32 = arith.constant 0 : i32
    %c0_i32_0 = arith.constant 0 : i32
    %c0_i32_1 = arith.constant 0 : i32
    return %c0_i32, %c0_i32_0 : i32, i32
  }
  func.func @transform_3(%arg0: i32) -> (i32, i32) {
    %c0_i32 = arith.constant 0 : i32
    %c0_i32_0 = arith.constant 0 : i32
    %c0_i32_1 = arith.constant 0 : i32
    return %c0_i32, %c0_i32_0 : i32, i32
  }
  func.func @transform_4(%arg0: i32) -> (i32, i32) {
    %c0_i32 = arith.constant 0 : i32
    %c0_i32_0 = arith.constant 0 : i32
    %c0_i32_1 = arith.constant 0 : i32
    return %c0_i32, %c0_i32_0 : i32, i32
  }
  func.func @transform_5(%arg0: i32) -> (i32, i32) {
    %c0_i32 = arith.constant 0 : i32
    %c0_i32_0 = arith.constant 0 : i32
    %c0_i32_1 = arith.constant 0 : i32
    return %c0_i32, %c0_i32_0 : i32, i32
  }
  func.func @transform_6(%arg0: i32) -> (i32, i32) {
    %c0_i32 = arith.constant 0 : i32
    %c0_i32_0 = arith.constant 0 : i32
    %c0_i32_1 = arith.constant 0 : i32
    return %c0_i32, %c0_i32_0 : i32, i32
  }
  func.func @transform_7(%arg0: i32) -> (i32, i32) {
    %c0_i32 = arith.constant 0 : i32
    %c0_i32_0 = arith.constant 0 : i32
    %c0_i32_1 = arith.constant 0 : i32
    return %c0_i32, %c0_i32_0 : i32, i32
  }
  func.func @transform_8(%arg0: i32) -> (i32, i32) {
    %c0_i32 = arith.constant 0 : i32
    %c0_i32_0 = arith.constant 0 : i32
    %c0_i32_1 = arith.constant 0 : i32
    return %c0_i32, %c0_i32_0 : i32, i32
  }
  func.func @transform_9(%arg0: i32) -> (i32, i32) {
    %c0_i32 = arith.constant 0 : i32
    %c0_i32_0 = arith.constant 0 : i32
    return %arg0, %c0_i32 : i32, i32
  }
  func.func @transform_10(%arg0: i32) -> (i32, i32) {
    %c0_i32 = arith.constant 0 : i32
    %c0_i32_0 = arith.constant 0 : i32
    return %arg0, %c0_i32 : i32, i32
  }
}

</mosaic_0001>

<bundles_post_ra>
// kernel: tpu_custom_call.1
= control target key start
LH: loop header
LB: loop body
LE: loop exit
PB: predicated region body
PF: predicated region fallthrough
CT: control target
= control target key end

     0   :  { %16 = vsyncpa [#allocation3], 0  ;;  %s1395_s0 = inlined_call_operand.hbm [shape: f32[16,32], index: 0, kind: input, shape index: {}]   ;;  %s1396_s1 = inlined_call_operand.hbm [shape: bf16[32,256], index: 1, kind: input, shape index: {}]   ;;  %s1397_s2 = inlined_call_operand.hbm [shape: f32[1,256], index: 2, kind: input, shape index: {}]   ;;  %s1398_s3 = inlined_call_operand.hbm [shape: bf16[256,256], index: 3, kind: input, shape index: {}]   ;;  %s1399_s4 = inlined_call_operand.vmem [shape: f32[1,256], index: 4, kind: input, shape index: {}]   ;;  %s1400_s5 = inlined_call_operand.hbm [shape: bf16[256,128], index: 5, kind: input, shape index: {}]   ;;  %s1401_s6 = inlined_call_operand.vmem [shape: f32[1,128], index: 6, kind: input, shape index: {}]   ;;  %s1402_s7 = inlined_call_operand.hbm [shape: bf16[128,128], index: 7, kind: input, shape index: {}]   ;;  %s1403_s8 = inlined_call_operand.vmem [shape: f32[1,128], index: 8, kind: input, shape index: {}]   ;;  %s1404_s9 = inlined_call_operand.hbm [shape: bf16[16,128], index: 9, kind: output, shape index: {0}]   ;;  %s1405_s10 = inlined_call_operand.vmem [shape: s32[16,1], index: 10, kind: output, shape index: {1}]  }
   0x1   :  { %17 = vsyncpa [#allocation6], 0 }
   0x2   :  { %18 = vsyncpa [#allocation9], 0 }
   0x3   :  { %19 = vsyncpa [#allocation12], 0 }
   0x4   :  { %20 = vsyncpa [#allocation4], 0  ;;  %s38_s15 = sshll.u32 %s1396_s1, 4  ;;  %s1282_s16 = smov [#allocation5]   ;;  %s39_s15 = int_to_ptr.hbm [resolvable:$true] %s38_s15 }
   0x5   :  { %s40_s17 = sshll.u32 %s1282_s16, 4  ;;  %s62_s20 = sshll.u32 %s1398_s3, 4  ;;  %s41_s17 = int_to_ptr.vmem [resolvable:$true] %s40_s17  ;;  %s63_s20 = int_to_ptr.hbm [resolvable:$true] %s62_s20 }
   0x6   :  { %s1283_s21 = smov 128   ;;  %s1284_s22 = smov 8  }
   0x7   :  { %46 = dma.hbm_to_vmem [thread:$0]  %s39_s15, 512, %s41_s17, [#allocation6], %s1283_s21, %s1283_s21, %s1284_s22  }
   0x8   :  { %s1285_s23 = smov [#allocation8]   ;;  %s25_s27 = sshll.u32 %s1395_s0, 4  ;;  %s26_s27 = int_to_ptr.hbm [resolvable:$true] %s25_s27 }
   0x9   :  { %s64_s24 = sshll.u32 %s1285_s23, 4  ;;  %s52_s29 = sshll.u32 %s1397_s2, 4  ;;  %s65_s24 = int_to_ptr.vmem [resolvable:$true] %s64_s24  ;;  %s53_s29 = int_to_ptr.hbm [resolvable:$true] %s52_s29 }
   0xa   :  { %70 = dma.hbm_to_vmem [thread:$0]  %s63_s20, 4096, %s65_s24, [#allocation9], %s1283_s21, %s1283_s21, %s1284_s22  }
   0xb   :  { %s1286_s30 = smov [#allocation2]   ;;  %s1287_s3 = smov [#allocation7]  }
   0xc   :  { %s27_s11 = sshll.u32 %s1286_s30, 4  ;;  %s54_s12 = sshll.u32 %s1287_s3, 4  ;;  %s28_s11 = int_to_ptr.vmem [resolvable:$true] %s27_s11  ;;  %s55_s12 = int_to_ptr.vmem [resolvable:$true] %s54_s12 }
   0xd   :  { %33 = dma.hbm_to_vmem [thread:$0]  %s26_s27, 256, %s28_s11, [#allocation3], %s1283_s21, %s1283_s21, %s1284_s22  }
   0xe   :  { %s77_s15 = sshll.u32 %s1400_s5, 4  ;;  %s1288_s0 = smov [#allocation10]   ;;  %s78_s15 = int_to_ptr.hbm [resolvable:$true] %s77_s15 }
   0xf   :  { %57 = dma.hbm_to_vmem [thread:$0]  %s53_s29, 32, %s55_s12, [#allocation6]  }
  0x10   :  { %s79_s16 = sshll.u32 %s1288_s0, 4  ;;  %s92_s2 = sshll.u32 %s1402_s7, 4  ;;  %s80_s16 = int_to_ptr.vmem [resolvable:$true] %s79_s16  ;;  %s93_s2 = int_to_ptr.hbm [resolvable:$true] %s92_s2 }
  0x11   :  { %s1289_s19 = smov 64   ;;  %s1290_s20 = smov 4  }
  0x12   :  { %85 = dma.hbm_to_vmem [thread:$0]  %s78_s15, 2048, %s80_s16, [#allocation9], %s1289_s19, %s1289_s19, %s1290_s20  }
  0x13   :  { %s1291_s21 = smov [#allocation11]  }
  0x14   :  { %s94_s22 = sshll.u32 %s1291_s21, 4  ;;  %s95_s22 = int_to_ptr.vmem [resolvable:$true] %s94_s22 }
  0x15   :  { %100 = dma.hbm_to_vmem [thread:$0]  %s93_s2, 1024, %s95_s22, [#allocation12], %s1289_s19, %s1289_s19, %s1290_s20  }
  0x16   :  { %1272 = dma.done.wait [#allocation3], 256  }
  0x17   :  { %1273 = vsyncadd [#allocation3], 4294967040 }
  0x18   :  { %1274 = dma.done.wait [#allocation6], 544  }
  0x19   :  { %1275 = vsyncadd [#allocation6], 4294966752 }
  0x1a   :  { %1276 = dma.done.wait [#allocation9], 6144  }
  0x1b   :  { %1277 = vsyncadd [#allocation9], 4294961152 }
  0x1c   :  { %1278 = dma.done.wait [#allocation12], 1024  }
  0x1d   :  { %1279 = vsyncadd [#allocation12], 4294966272  ;;  %v794_v0 = vld [vmem:[#allocation5 + $0x10] sm:$0xf]  ;;  %v1029_v1 = vld [vmem:[#allocation5 + $0x14] sm:$0xf0] }
  0x1e   :  { %v786_v2 = vld [vmem:[#allocation5] sm:$0xf]  ;;  %v795_v3 = vor.u32 %v1029_v1, %v794_v0  ;;  %v1027_v4 = vld [vmem:[#allocation5 + $0x4] sm:$0xf0]  ;;  %v128_v5 = vld [vmem:[#allocation2] sm:$0xff]  ;;  %vm161_vm0 = vcmask 261120  }
  0x1f   :  { %v129_v6 = vld [vmem:[#allocation2 + $0x8] sm:$0xff]  ;;  %v1028_v7 = vld [vmem:[#allocation5 + $0x14] sm:$0xf]  ;;  %v787_v9 = vor.u32 %v1027_v4, %v786_v2  ;;  %v1026_v10 = vld [vmem:[#allocation5 + $0x4] sm:$0xf]  ;;  %s764_s1 = sshll.u32 %s1404_s9, 4  ;;  %s765_s1 = int_to_ptr.hbm [resolvable:$true] %s764_s1 }
  0x20   :  { %v796_v8 = vld [vmem:[#allocation5 + $0x18] sm:$0xf0]  ;;  %171 = vmatpush.bf16.msra.mxu1 %v795_v3  ;;  %v788_v11 = vld [vmem:[#allocation5 + $0x8] sm:$0xf0]  ;;  %v860_v12 = vld [vmem:[#allocation8 + $0x70] sm:$0xf]  ;;  %v130_v23 = vpack.c.bf16 %v129_v6, %v128_v5 }
  0x21   :  { %v1045_v13 = vld [vmem:[#allocation8 + $0x74] sm:$0xf0]  ;;  %v799_v14 = vor.u32 %v1028_v7, %v796_v8  ;;  %v1044_v16 = vld [vmem:[#allocation8 + $0x74] sm:$0xf]  ;;  %v862_v17 = vld [vmem:[#allocation8 + $0x78] sm:$0xf0]  ;;  %v791_v28 = vor.u32 %v1026_v10, %v788_v11 }
  0x22   :  { %v861_v15 = vor.u32 %v1045_v13, %v860_v12  ;;  %v852_v18 = vld [vmem:[#allocation8 + $0x60] sm:$0xf]  ;;  %v865_v19 = vor.u32 %v1044_v16, %v862_v17  ;;  %v1043_v20 = vld [vmem:[#allocation8 + $0x64] sm:$0xf0]  ;;  %v1042_v21 = vld [vmem:[#allocation8 + $0x64] sm:$0xf] }
  0x23   :  { %v854_v22 = vld [vmem:[#allocation8 + $0x68] sm:$0xf0]  ;;  %v853_v24 = vor.u32 %v1043_v20, %v852_v18  ;;  %v844_v26 = vld [vmem:[#allocation8 + $0x50] sm:$0xf]  ;;  %v1041_v27 = vld [vmem:[#allocation8 + $0x54] sm:$0xf0] }
  0x24   :  { %397 = vmatpush.bf16.msra.mxu2 %v861_v15  ;;  %172 = vmatpush.bf16.msra.mxu1 %v787_v9  ;;  %v857_v25 = vor.u32 %v1042_v21, %v854_v22  ;;  %v1040_v29 = vld [vmem:[#allocation8 + $0x54] sm:$0xf]  ;;  %v846_v30 = vld [vmem:[#allocation8 + $0x58] sm:$0xf0]  ;;  %v845_v31 = vor.u32 %v1041_v27, %v844_v26  ;;  %v836_v33 = vld [vmem:[#allocation8 + $0x40] sm:$0xf] }
  0x25   :  { %425 = vmatpush.bf16.msra.mxu0 %v865_v19  ;;  %v849_v32 = vor.u32 %v1040_v29, %v846_v30  ;;  %v1039_v34 = vld [vmem:[#allocation8 + $0x44] sm:$0xf0]  ;;  %v1038_v35 = vld [vmem:[#allocation8 + $0x44] sm:$0xf]  ;;  %v838_v36 = vld [vmem:[#allocation8 + $0x48] sm:$0xf0] }
  0x26   :  { %v837_v37 = vor.u32 %v1039_v34, %v836_v33  ;;  %v841_v38 = vor.u32 %v1038_v35, %v838_v36  ;;  %v828_v39 = vld [vmem:[#allocation8 + $0x30] sm:$0xf]  ;;  %v1037_v40 = vld [vmem:[#allocation8 + $0x34] sm:$0xf0]  ;;  %v1036_v44 = vld [vmem:[#allocation8 + $0x34] sm:$0xf] }
  0x27   :  { %800 = vmatmul.msk.bf16.vlgmr.msra.gmra.mxu1 %vm161_vm0, %v130_v23  ;;  %v924_v41 = vld [vmem:[#allocation8 + $0xf0] sm:$0xf]  ;;  %v829_v42 = vor.u32 %v1037_v40, %v828_v39  ;;  %v1061_v43 = vld [vmem:[#allocation8 + $0xf4] sm:$0xf0]  ;;  %v830_v45 = vld [vmem:[#allocation8 + $0x38] sm:$0xf0] }
  0x28   :  { %185 = vmatpush.bf16.msrb.mxu1 %v799_v14  ;;  %398 = vmatpush.bf16.msra.mxu2 %v853_v24  ;;  %v925_v46 = vor.u32 %v1061_v43, %v924_v41  ;;  %v833_v47 = vor.u32 %v1036_v44, %v830_v45  ;;  %v1060_v48 = vld [vmem:[#allocation8 + $0xf4] sm:$0xf]  ;;  %v926_v49 = vld [vmem:[#allocation8 + $0xf8] sm:$0xf0]  ;;  %v820_v51 = vld [vmem:[#allocation8 + $0x20] sm:$0xf] }
  0x29   :  { %426 = vmatpush.bf16.msra.mxu0 %v857_v25  ;;  %v929_v50 = vor.u32 %v1060_v48, %v926_v49  ;;  %v1035_v52 = vld [vmem:[#allocation8 + $0x24] sm:$0xf0]  ;;  %v916_v53 = vld [vmem:[#allocation8 + $0xe0] sm:$0xf]  ;;  %v1034_v56 = vld [vmem:[#allocation8 + $0x24] sm:$0xf] }
  0x2a   :  { %411 = vmatpush.bf16.msra.mxu3 %v925_v46  ;;  %v821_v54 = vor.u32 %v1035_v52, %v820_v51  ;;  %v1059_v55 = vld [vmem:[#allocation8 + $0xe4] sm:$0xf0]  ;;  %v822_v57 = vld [vmem:[#allocation8 + $0x28] sm:$0xf0]  ;;  %v1058_v60 = vld [vmem:[#allocation8 + $0xe4] sm:$0xf] }
  0x2b   :  { %v917_v58 = vor.u32 %v1059_v55, %v916_v53  ;;  %v825_v59 = vor.u32 %v1034_v56, %v822_v57  ;;  %v918_v61 = vld [vmem:[#allocation8 + $0xe8] sm:$0xf0]  ;;  %v812_v63 = vld [vmem:[#allocation8 + $0x10] sm:$0xf]  ;;  %v1033_v0 = vld [vmem:[#allocation8 + $0x14] sm:$0xf0] }
  0x2c   :  { %186 = vmatpush.bf16.msrb.mxu1 %v791_v28  ;;  %399 = vmatpush.bf16.msra.mxu2 %v845_v31  ;;  %v921_v62 = vor.u32 %v1058_v60, %v918_v61  ;;  %v908_v1 = vld [vmem:[#allocation8 + $0xd0] sm:$0xf]  ;;  %v813_v2 = vor.u32 %v1033_v0, %v812_v63  ;;  %v1057_v3 = vld [vmem:[#allocation8 + $0xd4] sm:$0xf0]  ;;  %v1032_v4 = vld [vmem:[#allocation8 + $0x14] sm:$0xf] }
  0x2d   :  { %427 = vmatpush.bf16.msra.mxu0 %v849_v32  ;;  %v814_v5 = vld [vmem:[#allocation8 + $0x18] sm:$0xf0]  ;;  %v909_v6 = vor.u32 %v1057_v3, %v908_v1  ;;  %v1056_v8 = vld [vmem:[#allocation8 + $0xd4] sm:$0xf]  ;;  %v804_v11 = vld [vmem:[#allocation8] sm:$0xf] }
  0x2e   :  { %412 = vmatpush.bf16.msra.mxu3 %v917_v58  ;;  %v817_v7 = vor.u32 %v1032_v4, %v814_v5  ;;  %v910_v9 = vld [vmem:[#allocation8 + $0xd8] sm:$0xf0]  ;;  %v1031_v12 = vld [vmem:[#allocation8 + $0x4] sm:$0xf0]  ;;  %v900_v13 = vld [vmem:[#allocation8 + $0xc0] sm:$0xf] }
  0x2f   :  { %v913_v10 = vor.u32 %v1056_v8, %v910_v9  ;;  %v805_v14 = vor.u32 %v1031_v12, %v804_v11  ;;  %v1055_v15 = vld [vmem:[#allocation8 + $0xc4] sm:$0xf0]  ;;  %v1030_v16 = vld [vmem:[#allocation8 + $0x4] sm:$0xf]  ;;  %v806_v17 = vld [vmem:[#allocation8 + $0x8] sm:$0xf0] }
  0x30   :  { %400 = vmatpush.bf16.msra.mxu2 %v837_v37  ;;  %439 = vmatpush.bf16.msra.mxu1 %v929_v50  ;;  %v901_v18 = vor.u32 %v1055_v15, %v900_v13  ;;  %v809_v19 = vor.u32 %v1030_v16, %v806_v17  ;;  %v1054_v20 = vld [vmem:[#allocation8 + $0xc4] sm:$0xf]  ;;  %v902_v21 = vld [vmem:[#allocation8 + $0xc8] sm:$0xf0]  ;;  %v1053_v24 = vld [vmem:[#allocation8 + $0xb4] sm:$0xf0] }
  0x31   :  { %428 = vmatpush.bf16.msra.mxu0 %v841_v38  ;;  %v905_v22 = vor.u32 %v1054_v20, %v902_v21  ;;  %v1052_v25 = vld [vmem:[#allocation8 + $0xb4] sm:$0xf]  ;;  %v894_v27 = vld [vmem:[#allocation8 + $0xb8] sm:$0xf0]  ;;  %v884_v29 = vld [vmem:[#allocation8 + $0xa0] sm:$0xf] }
  0x32   :  { %413 = vmatpush.bf16.msra.mxu3 %v909_v6  ;;  %v897_v28 = vor.u32 %v1052_v25, %v894_v27  ;;  %v1051_v30 = vld [vmem:[#allocation8 + $0xa4] sm:$0xf0]  ;;  %v1050_v31 = vld [vmem:[#allocation8 + $0xa4] sm:$0xf]  ;;  %v886_v33 = vld [vmem:[#allocation8 + $0xa8] sm:$0xf0] }
  0x33   :  { %v885_v32 = vor.u32 %v1051_v30, %v884_v29  ;;  %v889_v34 = vor.u32 %v1050_v31, %v886_v33  ;;  %v876_v35 = vld [vmem:[#allocation8 + $0x90] sm:$0xf]  ;;  %v1049_v36 = vld [vmem:[#allocation8 + $0x94] sm:$0xf0]  ;;  %v1048_v37 = vld [vmem:[#allocation8 + $0x94] sm:$0xf] }
  0x34   :  { %401 = vmatpush.bf16.msra.mxu2 %v829_v42  ;;  %440 = vmatpush.bf16.msra.mxu1 %v921_v62  ;;  %v877_v38 = vor.u32 %v1049_v36, %v876_v35  ;;  %v878_v39 = vld [vmem:[#allocation8 + $0x98] sm:$0xf0]  ;;  %v868_v41 = vld [vmem:[#allocation8 + $0x80] sm:$0xf]  ;;  %v1047_v42 = vld [vmem:[#allocation8 + $0x84] sm:$0xf0] }
  0x35   :  { %429 = vmatpush.bf16.msra.mxu0 %v833_v47  ;;  %v881_v40 = vor.u32 %v1048_v37, %v878_v39  ;;  %v1046_v43 = vld [vmem:[#allocation8 + $0x84] sm:$0xf]  ;;  %v869_v44 = vor.u32 %v1047_v42, %v868_v41  ;;  %v870_v45 = vld [vmem:[#allocation8 + $0x88] sm:$0xf0]  ;;  %v135_v47 = vld [vmem:[#allocation7] sm:$0x3] }
  0x36   :  { %414 = vmatpush.bf16.msra.mxu3 %v901_v18  ;;  %v873_v46 = vor.u32 %v1046_v43, %v870_v45  ;;  %v137_v49 = vperm.slane %v135_v47, 0  ;;  %v138_v57 = vperm.slane %v135_v47, 1  ;;  %v1077_v0 = vld [vmem:[#allocation10 + $0x78] sm:$0xff]  ;;  %v1076_v1 = vld [vmem:[#allocation10 + $0x70] sm:$0xff]  ;;  %v1075_v3 = vld [vmem:[#allocation10 + $0x68] sm:$0xff]  ;;  %vm755_vm6 = vcmask 7168  }
  0x37   :  { %801 = vmatmul.msk.bf16.vlgmr.msrb.gmra.mxu1 %vm161_vm0, %v130_v23  ;;  %v892_v23 = vld [vmem:[#allocation8 + $0xb0] sm:$0xf]  ;;  %v1074_v5 = vld [vmem:[#allocation10 + $0x60] sm:$0xff]  ;;  %v1067_v6 = vld [vmem:[#allocation10 + $0x28] sm:$0xff] }
  0x38   :  { %402 = vmatpush.bf16.msra.mxu2 %v821_v54  ;;  %441 = vmatpush.bf16.msra.mxu1 %v913_v10  ;;  %v893_v26 = vor.u32 %v1053_v24, %v892_v23  ;;  %v1068_v4 = vld [vmem:[#allocation10 + $0x30] sm:$0xff]  ;;  %v1066_v8 = vld [vmem:[#allocation10 + $0x20] sm:$0xff]  ;;  %v1065_v10 = vld [vmem:[#allocation10 + $0x18] sm:$0xff] }
  0x39   :  { %430 = vmatpush.bf16.msra.mxu0 %v825_v59  ;;  %v1072_v9 = vld [vmem:[#allocation10 + $0x50] sm:$0xff]  ;;  %v1071_v11 = vld [vmem:[#allocation10 + $0x48] sm:$0xff]  ;;  %v1070_v13 = vld [vmem:[#allocation10 + $0x40] sm:$0xff] }
  0x3a   :  { %415 = vmatpush.bf16.msra.mxu3 %v893_v26  ;;  %v1064_v12 = vld [vmem:[#allocation10 + $0x10] sm:$0xff]  ;;  %v1062_v15 = vld [vmem:[#allocation10] sm:$0xff]  ;;  %v1085_v16 = vld [vmem:[#allocation11 + $0x38] sm:$0xff] }
  0x3b   :  { %v1084_v17 = vld [vmem:[#allocation11 + $0x30] sm:$0xff]  ;;  %v1083_v43 = vld [vmem:[#allocation11 + $0x28] sm:$0xff]  ;;  %v1081_v45 = vld [vmem:[#allocation11 + $0x18] sm:$0xff] }
  0x3c   :  { %403 = vmatpush.bf16.msra.mxu2 %v813_v2  ;;  %442 = vmatpush.bf16.msra.mxu1 %v905_v22  ;;  %v1069_v2 = vld [vmem:[#allocation10 + $0x38] sm:$0xff]  ;;  %v1079_v47 = vld [vmem:[#allocation11 + $0x8] sm:$0xff] }
  0x3d   :  { %431 = vmatpush.bf16.msra.mxu0 %v817_v7  ;;  %v1073_v7 = vld [vmem:[#allocation10 + $0x58] sm:$0xff] }
  0x3e   :  { %416 = vmatpush.bf16.msra.mxu3 %v885_v32 }
  0x40   :  { %404 = vmatpush.bf16.msra.mxu2 %v805_v14  ;;  %443 = vmatpush.bf16.msra.mxu1 %v897_v28  ;;  %v1063_v14 = vld [vmem:[#allocation10 + $0x8] sm:$0xff] }
  0x41   :  { %432 = vmatpush.bf16.msra.mxu0 %v809_v19  ;;  %v231_v19 = vld [vmem:[%s1399_s4] sm:$0x3] }
  0x42   :  { %417 = vmatpush.bf16.msra.mxu3 %v877_v38  ;;  %v234_v22 = vperm.slane %v231_v19, 1  ;;  %v233_v26 = vperm.slane %v231_v19, 0 }
  0x44   :  { %444 = vmatpush.bf16.msra.mxu1 %v889_v34  ;;  %591 = vmatpush.bf16.msrb.mxu2 %v1069_v2 }
  0x45   :  { %690 = vmatpush.bf16.msrb.mxu0 %v1085_v16 }
  0x46   :  { %418 = vmatpush.bf16.msra.mxu3 %v869_v44  ;;  %v1082_v44 = vld [vmem:[#allocation11 + $0x20] sm:$0xff] }
  0x48   :  { %445 = vmatpush.bf16.msra.mxu1 %v881_v40  ;;  %592 = vmatpush.bf16.msrb.mxu2 %v1068_v4 }
  0x49   :  { %691 = vmatpush.bf16.msrb.mxu0 %v1084_v17 }
  0x4a   :  { %605 = vmatpush.bf16.msrb.mxu3 %v1077_v0 }
  0x4c   :  { %446 = vmatpush.bf16.msra.mxu1 %v873_v46  ;;  %593 = vmatpush.bf16.msrb.mxu2 %v1067_v6  ;;  %v1080_v46 = vld [vmem:[#allocation11 + $0x10] sm:$0xff] }
  0x4d   :  { %692 = vmatpush.bf16.msrb.mxu0 %v1083_v43 }
  0x4e   :  { %606 = vmatpush.bf16.msrb.mxu3 %v1076_v1 }
  0x50   :  { %594 = vmatpush.bf16.msrb.mxu2 %v1066_v8 }
  0x51   :  { %693 = vmatpush.bf16.msrb.mxu0 %v1082_v44 }
  0x52   :  { %607 = vmatpush.bf16.msrb.mxu3 %v1075_v3 }
  0x54   :  { %595 = vmatpush.bf16.msrb.mxu2 %v1065_v10 }
  0x55   :  { %694 = vmatpush.bf16.msrb.mxu0 %v1081_v45 }
  0x56   :  { %608 = vmatpush.bf16.msrb.mxu3 %v1074_v5 }
  0x58   :  { %596 = vmatpush.bf16.msrb.mxu2 %v1064_v12 }
  0x59   :  { %695 = vmatpush.bf16.msrb.mxu0 %v1080_v46 }
  0x5a   :  { %609 = vmatpush.bf16.msrb.mxu3 %v1073_v7 }
  0x5c   :  { %597 = vmatpush.bf16.msrb.mxu2 %v1063_v14 }
  0x5d   :  { %696 = vmatpush.bf16.msrb.mxu0 %v1079_v47 }
  0x5e   :  { %610 = vmatpush.bf16.msrb.mxu3 %v1072_v9 }
  0x60   :  { %598 = vmatpush.bf16.msrb.mxu2 %v1062_v15 }
  0x62   :  { %611 = vmatpush.bf16.msrb.mxu3 %v1071_v11 }
  0x66   :  { %612 = vmatpush.bf16.msrb.mxu3 %v1070_v13 }
  0xa4   :  { %v174_v48 = vpop.f32.mrf.mxu1 }
  0xa5   :  { %v175_v50 = vadd.f32 %v174_v48, %v137_v49  ;;  %v1078_v48 = vld [vmem:[#allocation11] sm:$0xff] }
  0xa6   :  { %697 = vmatpush.bf16.msrb.mxu0 %v1078_v48 }
  0xa7   :  { %v193_v53 = vmax.f32 %v175_v50, 0.0 }
  0xac   :  { %v176_v51 = vpop.f32.mrf.mxu1 }
  0xad   :  { %v177_v52 = vadd.f32 %v176_v51, %v137_v49  ;;  %v1102_v51 = vld [vmem:[%s1401_s6] ss:$0 sm:$0xff]  ;;  %s1292_s6 = smov [#allocation13]  }
  0xaf   :  { %v195_v54 = vmax.f32 %v177_v52, 0.0 }
  0xb1   :  { %v197_v55 = vpack.c.bf16 %v195_v54, %v193_v53 }
  0xb3   :  { %405 = vmatmul.bf16.vlgmr.msra.gmra.mxu2 %v197_v55  ;;  %433 = vmatmul.bf16.vlgmr.msra.gmra.mxu0 %v197_v55 }
  0xb4   :  { %v188_v56 = vpop.f32.mrf.mxu1 }
  0xb5   :  { %v189_v58 = vadd.f32 %v188_v56, %v138_v57 }
  0xb7   :  { %v194_v61 = vmax.f32 %v189_v58, 0.0 }
  0xbc   :  { %v190_v59 = vpop.f32.mrf.mxu1 }
  0xbd   :  { %v191_v60 = vadd.f32 %v190_v59, %v138_v57 }
  0xbf   :  { %v196_v62 = vmax.f32 %v191_v60, 0.0 }
  0xc1   :  { %v198_v63 = vpack.c.bf16 %v196_v62, %v194_v61  ;;  %v710_v61 = vlaneseq  ;;  %v1103_v62 = vld [vmem:[%s1403_s8] ss:$0 sm:$0xff]  ;;  %s762_s8 = sshll.u32 %s1292_s6, 4  ;;  %s763_s8 = int_to_ptr.vmem [resolvable:$true] %s762_s8 }
  0xc3   :  { %419 = vmatmul.bf16.vlgmr.msra.gmra.mxu3 %v198_v63  ;;  %447 = vmatmul.bf16.vlgmr.msra.gmra.mxu1 %v198_v63  ;;  %v711_v0 = vand.u32 127, %v710_v61 }
  0xc5   :  { %vm712_vm1 = vcmp.lt.s32.totalorder %v711_v0, 27 }
 0x130   :  { %v434_v18 = vpop.f32.mrf.mxu0 }
 0x131   :  { %v435_v24 = vadd.f32 %v434_v18, %v234_v22 }
 0x136   :  { %v406_v20 = vpop.f32.mrf.mxu2 }
 0x137   :  { %v407_v32 = vadd.f32 %v406_v20, %v233_v26 }
 0x138   :  { %v436_v23 = vpop.f32.mrf.mxu0 }
 0x139   :  { %v437_v27 = vadd.f32 %v436_v23, %v234_v22 }
 0x13e   :  { %v408_v31 = vpop.f32.mrf.mxu2 }
 0x13f   :  { %v409_v35 = vadd.f32 %v408_v31, %v233_v26 }
 0x140   :  { %v448_v21 = vpop.f32.mrf.mxu1 }
 0x141   :  { %v449_v28 = vadd.f32 %v448_v21, %v435_v24 }
 0x143   :  { %v454_v33 = vmax.f32 %v449_v28, 0.0 }
 0x146   :  { %v420_v25 = vpop.f32.mrf.mxu3 }
 0x147   :  { %v421_v36 = vadd.f32 %v420_v25, %v407_v32 }
 0x148   :  { %v450_v29 = vpop.f32.mrf.mxu1 }
 0x149   :  { %v451_v30 = vadd.f32 %v450_v29, %v437_v27  ;;  %v453_v40 = vmax.f32 %v421_v36, 0.0 }
 0x14b   :  { %v456_v34 = vmax.f32 %v451_v30, 0.0 }
 0x14d   :  { %v458_v37 = vpack.c.bf16 %v456_v34, %v454_v33 }
 0x14e   :  { %v422_v38 = vpop.f32.mrf.mxu3 }
 0x14f   :  { %v423_v39 = vadd.f32 %v422_v38, %v409_v35  ;;  %613 = vmatmul.bf16.vlgmr.msrb.gmra.mxu3 %v458_v37 }
 0x151   :  { %v455_v41 = vmax.f32 %v423_v39, 0.0 }
 0x153   :  { %v457_v42 = vpack.c.bf16 %v455_v41, %v453_v40 }
 0x155   :  { %599 = vmatmul.bf16.vlgmr.msrb.gmra.mxu2 %v457_v42 }
 0x1d2   :  { %v614_v49 = vpop.f32.mrf.mxu3 }
 0x1d8   :  { %v600_v50 = vpop.f32.mrf.mxu2 }
 0x1d9   :  { %v601_v52 = vadd.f32 %v1102_v51, %v600_v50 }
 0x1da   :  { %v616_v56 = vpop.f32.mrf.mxu3 }
 0x1db   :  { %v615_v54 = vadd.f32 %v614_v49, %v601_v52 }
 0x1dd   :  { %v619_v58 = vmax.f32 %v615_v54, 0.0 }
 0x1e0   :  { %v602_v53 = vpop.f32.mrf.mxu2 }
 0x1e1   :  { %v603_v55 = vadd.f32 %v1102_v51, %v602_v53 }
 0x1e3   :  { %v617_v57 = vadd.f32 %v616_v56, %v603_v55 }
 0x1e5   :  { %v620_v59 = vmax.f32 %v617_v57, 0.0 }
 0x1e7   :  { %v621_v60 = vpack.c.bf16 %v620_v59, %v619_v58 }
 0x1e9   :  { %698 = vmatmul.bf16.vlgmr.msrb.gmra.mxu0 %v621_v60 }
 0x266   :  { %v699_v63 = vpop.f32.mrf.mxu0 }
 0x267   :  { %v700_v1 = vadd.f32 %v1103_v62, %v699_v63 }
 0x269   :  { %v704_v2 = vpack.c.bf16 %v700_v1, %v700_v1 }
 0x26b   :  { %v708_v3 = vunpack.c.l.bf16 %v704_v2 }
 0x26d   :  { %v713_v4 = vsel %vm712_vm1, %v708_v3, -inf }
 0x26e   :  { %v701_v5 = vpop.f32.mrf.mxu0  ;;  %715 = vmax.xlane.f32.xlu0 %v713_v4 }
 0x26f   :  { %v702_v6 = vadd.f32 %v1103_v62, %v701_v5 }
 0x271   :  { %v705_v7 = vpack.c.bf16 %v702_v6, %v702_v6  ;;  %v1089_v8 = vpack.c.bf16 %v702_v6, %v700_v1 }
 0x273   :  { %1090 = vst [vmem:[#allocation13] sm:$0xff] %v1089_v8   ;;  %v709_v9 = vunpack.c.l.bf16 %v705_v7 }
 0x274   :  { %770 = dma.vmem_to_hbm [thread:$0]  %s763_s8, 128, %s765_s1, [#allocation4], %s1289_s19, %s1289_s19, %s1290_s20  }
 0x275   :  { %v714_v10 = vsel %vm712_vm1, %v709_v9, -inf }
 0x276   :  { %717 = vmax.xlane.f32.xlu0 %v714_v10 }
 0x2e1   :  { %v716_v11 = vpop.xlane.xlu0 %715 }
 0x2e2   :  { %vm719_vm2 = vcmp.eq.f32.partialorder %v713_v4, %v716_v11 }
 0x2e3   :  { %v721_v12 = vsel %vm719_vm2, %v711_v0, 128 }
 0x2e4   :  { %v724_v13 = vshra.s32 %v721_v12, 16  ;;  %v723_v19 = vand.u32 65535, %v721_v12 }
 0x2e6   :  { %v726_v14 = vcvt.s32.f32 %v724_v13  ;;  %v725_v21 = vcvt.s32.f32 %v723_v19 }
 0x2e8   :  { %727 = vmin.xlane.f32.xlu1 %v726_v14 }
 0x2e9   :  { %v718_v15 = vpop.xlane.xlu0 %717 }
 0x2ea   :  { %vm720_vm3 = vcmp.eq.f32.partialorder %v714_v10, %v718_v15 }
 0x2eb   :  { %v722_v16 = vsel %vm720_vm3, %v711_v0, 128 }
 0x2ec   :  { %v738_v17 = vshra.s32 %v722_v16, 16  ;;  %v737_v23 = vand.u32 65535, %v722_v16 }
 0x2ee   :  { %v740_v18 = vcvt.s32.f32 %v738_v17  ;;  %v739_v25 = vcvt.s32.f32 %v737_v23 }
 0x2f0   :  { %741 = vmin.xlane.f32.xlu1 %v740_v18 }
 0x35b   :  { %v728_v20 = vpop.xlane.xlu1 %727 }
 0x35c   :  { %vm729_vm4 = vcmp.eq.f32.partialorder %v726_v14, %v728_v20  ;;  %v734_v27 = vcvt.f32.s32 %v728_v20 }
 0x35d   :  { %v730_v22 = vsel %vm729_vm4, %v725_v21, inf }
 0x35e   :  { %731 = vmin.xlane.f32.xlu2 %v730_v22  ;;  %v735_v29 = vshll.u32 %v734_v27, 16 }
 0x363   :  { %v742_v24 = vpop.xlane.xlu1 %741 }
 0x364   :  { %vm743_vm5 = vcmp.eq.f32.partialorder %v740_v18, %v742_v24  ;;  %v748_v32 = vcvt.f32.s32 %v742_v24 }
 0x365   :  { %v744_v26 = vsel %vm743_vm5, %v739_v25, inf }
 0x366   :  { %745 = vmin.xlane.f32.xlu2 %v744_v26  ;;  %v749_v35 = vshll.u32 %v748_v32, 16 }
 0x3d1   :  { %v732_v28 = vpop.xlane.xlu2 %731 }
 0x3d2   :  { %v733_v30 = vcvt.f32.s32 %v732_v28 }
 0x3d4   :  { %v736_v31 = vadd.s32 %v735_v29, %v733_v30 }
 0x3d6   :  { %vm751_vm7 = vcmp.lt.s32.totalorder %v736_v31, 26 }
 0x3d7   :  { %v752_v33 = vsel %vm751_vm7, %v736_v31, 26 }
 0x3d8   :  { %756 = vst.msk [vmem:[%s1405_s10] sm:$0xff] %vm755_vm6, %v752_v33 }
 0x3d9   :  { %v746_v34 = vpop.xlane.xlu2 %745 }
 0x3da   :  { %v747_v36 = vcvt.f32.s32 %v746_v34 }
 0x3dc   :  { %v750_v37 = vadd.s32 %v749_v35, %v747_v36 }
 0x3de   :  { %vm753_vm8 = vcmp.lt.s32.totalorder %v750_v37, 26 }
 0x3df   :  { %v754_v38 = vsel %vm753_vm8, %v750_v37, 26 }
 0x3e0   :  { %757 = vst.msk [vmem:[%s1405_s10 + $0x8] sm:$0xff] %vm755_vm6, %v754_v38 }
 0x3e1   :  { %1280 = dma.done.wait [#allocation4], 128  }
 0x3e2   :  { %1281 = vsyncadd [#allocation4], 4294967168 }
 0x3e3   :  { %779 = vsyncpa [#allocation3], 1 }
 0x3e4   :  { %780 = vsyncpa [#allocation6], 1 }
 0x3e5   :  { %781 = vsyncpa [#allocation9], 1 }
 0x3e6   :  { %782 = vsyncpa [#allocation12], 1 }
 0x3e7   :  { %783 = vsyncpa [#allocation4], 1 }

</bundles_post_ra>
